<compile_context>
chip_gen: v7x
topology: tpu7x:2x2x1
jax: 0.10.0
libtpu: 0.0.40
codegen_flags: <defaults>
</compile_context>

<pallas_src>
import math

import jax
import jax.numpy as jnp
from jax.experimental import pallas as pl
from jax.experimental.pallas import tpu as pltpu


def _softmax(z, axis, approx):
    m = jnp.max(z, axis=axis, keepdims=True)
    e = jnp.exp(z - m)
    s = jnp.sum(e, axis=axis, keepdims=True)
    if approx:
        return e * pl.reciprocal(s, approx=True)   # EUP slot, off the VPU critical path
    return e / s


def _curve_agg_kernel(x_ref, cv_ref, watt_ref, wa_ref, wb_ref, wc_ref,
                      p_ref, q_ref, bnb_ref, out_ref):
    # x_ref : (C, N) f32      cv_ref : (C, Cn, Cl) f32
    # wa/wb/wc : (mid, C)     p/q : (C, mid)   in compute dtype (bf16 fast path / f32)
    cdt = wc_ref.dtype
    approx = cdt == jnp.bfloat16          # trace-time constant
    cn = cv_ref.shape[1]

    x = x_ref[...]                        # (C, N)      f32 (needed exactly for residual)
    cv = cv_ref[...]                      # (C, Cn, Cl) f32
    watt = watt_ref[...]                  # (C, 1)      f32

    # ---- curve-grid attention (small, not N-scaled; VPU) ----------------------------
    att = jnp.sum(cv * watt[:, :, None], axis=0)                  # (Cn, Cl)
    sm_l = _softmax(att, axis=1, approx=approx)                   # over curve length
    sm_n = _softmax(att, axis=0, approx=approx)                   # over curve number
    curver_inter = jnp.sum(cv * sm_l[None, :, :], axis=2)         # (C, Cn)
    curves_intra = jnp.sum(cv * sm_n[None, :, :], axis=1)         # (C, Cl)

    # ---- channel projections (MXU, bf16 operands, f32 accumulation) -----------------
    ci = jnp.dot(wa_ref[...], curver_inter.astype(cdt),
                 preferred_element_type=jnp.float32)              # (mid, Cn)
    cb = jnp.dot(wb_ref[...], curves_intra.astype(cdt),
                 preferred_element_type=jnp.float32)              # (mid, Cl)
    xc = jnp.dot(wc_ref[...], x.astype(cdt),
                 preferred_element_type=jnp.float32)              # (mid, N)

    # ---- fused point-to-curve scores, channel-first: (Cn+Cl, N) ---------------------
    cicb_t = jnp.concatenate([ci, cb], axis=1).T                  # (Cn+Cl, mid), tiny
    scores = jnp.dot(cicb_t.astype(cdt), xc.astype(cdt),
                     preferred_element_type=jnp.float32)          # (Cn+Cl, N)
    a_inter = _softmax(scores[:cn, :], axis=0, approx=approx)     # (Cn, N)
    a_intra = _softmax(scores[cn:, :], axis=0, approx=approx)     # (Cl, N)
    a_cat = jnp.concatenate([a_inter, a_intra], axis=0)           # (Cn+Cl, N), sublane-aligned

    # ---- folded convn/convl/convd projection, fused output matmul -------------------
    pci = jnp.dot(p_ref[...], ci.astype(cdt),
                  preferred_element_type=jnp.float32)             # (C, Cn)
    qcb = jnp.dot(q_ref[...], cb.astype(cdt),
                  preferred_element_type=jnp.float32)             # (C, Cl)
    pq = jnp.concatenate([pci, qcb], axis=1)                      # (C, Cn+Cl)

    d = jnp.dot(pq.astype(cdt), a_cat.astype(cdt),
                preferred_element_type=jnp.float32)               # (C, N)
    d = d + bnb_ref[...]                                          # folded BN bias

    y = x + d
    out_ref[...] = jnp.where(y >= 0.0, y, 0.2 * y)                # leaky_relu(0.2)


def curve_aggregation(x, curves, params, *, compute_dtype=jnp.bfloat16):
    B, C, N = x.shape
    _, _, Cn, Cl = curves.shape
    mid = C // 2
    cdt = compute_dtype

    # Fold eval-mode BN scale into convd, then fold convd halves with convn / convl.
    wd_s = params["bn_scale"] * params["wd"]                      # (C, 2*mid)
    P = (wd_s[:, :mid] @ params["wn"]).astype(cdt)                # (C, mid)
    Q = (wd_s[:, mid:] @ params["wl"]).astype(cdt)                # (C, mid)

    watt = params["watt"].astype(jnp.float32)                     # VPU path -> keep f32
    wa = params["wa"].astype(cdt)
    wb = params["wb"].astype(cdt)
    wc = params["wc"].astype(cdt)
    bnb = params["bn_bias"].astype(jnp.float32)

    in_specs = [
        pl.BlockSpec((None, C, N), lambda b: (b, 0, 0)),          # x (f32)
        pl.BlockSpec((None, C, Cn, Cl), lambda b: (b, 0, 0, 0)),  # curves (f32)
        pl.BlockSpec((C, 1), lambda b: (0, 0)),                   # line_conv_att weight
        pl.BlockSpec((mid, C), lambda b: (0, 0)),                 # conva
        pl.BlockSpec((mid, C), lambda b: (0, 0)),                 # convb
        pl.BlockSpec((mid, C), lambda b: (0, 0)),                 # convc
        pl.BlockSpec((C, mid), lambda b: (0, 0)),                 # P = bn*wd[:, :mid] @ wn
        pl.BlockSpec((C, mid), lambda b: (0, 0)),                 # Q = bn*wd[:, mid:] @ wl
        pl.BlockSpec((C, 1), lambda b: (0, 0)),                   # folded BN bias
    ]
    out_specs = pl.BlockSpec((None, C, N), lambda b: (b, 0, 0))

    # TODO(synk): for small B on single-TC v5e/v6e, fold the batch into one grid step
    #             to avoid the per-step fixed cost; grid=(B,) parallel is kept here as
    #             the general-purpose choice (feeds v7x's two TensorCores).
    return pl.pallas_call(
        _curve_agg_kernel,
        out_shape=jax.ShapeDtypeStruct((B, C, N), jnp.float32),
        grid=(B,),
        in_specs=in_specs,
        out_specs=out_specs,
        compiler_params=pltpu.CompilerParams(dimension_semantics=("parallel",)),
    )(x.astype(jnp.float32), curves.astype(jnp.float32),
      watt, wa, wb, wc, P, Q, bnb)


def reference(x, curves, p):
    """Pure-JAX mirror of the PyTorch forward (eval-mode BN)."""
    att = jnp.einsum("bcnl,c->bnl", curves, p["watt"][:, 0])
    sm_l = jax.nn.softmax(att, axis=-1)
    sm_n = jax.nn.softmax(att, axis=-2)
    curver_inter = jnp.sum(curves * sm_l[:, None], axis=-1)          # (B, C, Cn)
    curves_intra = jnp.sum(curves * sm_n[:, None], axis=-2)          # (B, C, Cl)
    ci = jnp.einsum("oc,bcn->bon", p["wa"], curver_inter)
    cb = jnp.einsum("oc,bcl->bol", p["wb"], curves_intra)
    xl = jnp.einsum("oc,bcn->bno", p["wc"], x)
    x_inter = jax.nn.softmax(jnp.einsum("bnm,bmk->bnk", xl, ci), axis=-1)
    x_intra = jax.nn.softmax(jnp.einsum("bnm,bml->bnl", xl, cb), axis=-1)
    cin = jnp.einsum("om,bmk->bko", p["wn"], ci)
    cln = jnp.einsum("om,bml->blo", p["wl"], cb)
    xi = jnp.einsum("bnk,bko->bno", x_inter, cin)
    xa = jnp.einsum("bnl,blo->bno", x_intra, cln)
    cf = jnp.concatenate([xi, xa], axis=-1)
    d = jnp.einsum("cf,bnf->bcn", p["wd"], cf)
    d = d * p["bn_scale"][None] + p["bn_bias"][None]
    y = x + d
    return jnp.where(y >= 0, y, 0.2 * y)


def make_params(key, in_channel):
    mid = in_channel // 2
    ks = jax.random.split(key, 7)

    def init(k, shape, fan_in):
        return jax.random.normal(k, shape, jnp.float32) * (1.0 / math.sqrt(fan_in))

    eps = 1e-5
    return {
        "watt": init(ks[0], (in_channel, 1), in_channel),       # Conv2d(C,1,1) weight
        "wa": init(ks[1], (mid, in_channel), in_channel),
        "wb": init(ks[2], (mid, in_channel), in_channel),
        "wc": init(ks[3], (mid, in_channel), in_channel),
        "wn": init(ks[4], (mid, mid), mid),
        "wl": init(ks[5], (mid, mid), mid),
        "wd": init(ks[6], (in_channel, 2 * mid), 2 * mid),
        # fresh BatchNorm1d (eval mode): gamma=1, beta=0, mean=0, var=1
        "bn_scale": jnp.full((in_channel, 1), 1.0 / math.sqrt(1.0 + eps), jnp.float32),
        "bn_bias": jnp.zeros((in_channel, 1), jnp.float32),
    }


if __name__ == "__main__":
    B, C, N = 2, 16, 128         # batch, in_channel, num_points (N lane-dense)
    Cn, Cl = 8, 16               # curve_num, curve_length

    key = jax.random.PRNGKey(0)
    kx, kc, kp = jax.random.split(key, 3)
    x = jax.random.normal(kx, (B, C, N), jnp.float32)
    curves = jax.random.normal(kc, (B, C, Cn, Cl), jnp.float32)
    params = make_params(kp, C)

    ref = jax.block_until_ready(reference(x, curves, params))

    # Exact-math path (f32 matmuls, exact softmax): validates the algebraic refactor.
    out_f32 = jax.block_until_ready(
        curve_aggregation(x, curves, params, compute_dtype=jnp.float32))
    if not jnp.allclose(out_f32, ref, rtol=1e-3, atol=1e-3):
        raise AssertionError("f32 Pallas kernel output mismatch vs JAX reference")

    # Fast path (bf16 MXU operands, f32 accumulation, EUP approx reciprocal).
    out_bf16 = jax.block_until_ready(
        curve_aggregation(x, curves, params, compute_dtype=jnp.bfloat16))
    if not jnp.allclose(out_bf16, ref, rtol=3e-2, atol=3e-2):
        raise AssertionError("bf16 Pallas kernel output mismatch vs JAX reference")

    print("KERNEL_OK")
</pallas_src>

<mosaic_0001>
module attributes {stable_mosaic.version = 11 : i64} {
  func.func @_curve_agg_kernel(%arg0: i32, %arg1: memref<1x16x128xf32, #tpu.memory_space<vmem>>, %arg2: memref<1x16x8x16xf32, #tpu.memory_space<vmem>>, %arg3: memref<16x1xf32, #tpu.memory_space<vmem>>, %arg4: memref<8x16xf32, #tpu.memory_space<vmem>>, %arg5: memref<8x16xf32, #tpu.memory_space<vmem>>, %arg6: memref<8x16xf32, #tpu.memory_space<vmem>>, %arg7: memref<16x8xf32, #tpu.memory_space<vmem>>, %arg8: memref<16x8xf32, #tpu.memory_space<vmem>>, %arg9: memref<16x1xf32, #tpu.memory_space<vmem>>, %arg10: memref<1x16x128xf32, #tpu.memory_space<vmem>>) attributes {dimension_semantics = [#tpu.dimension_semantics<parallel>], iteration_bounds = array<i64: 2>, scalar_prefetch = 0 : i64, scratch_operands = 0 : i64, tpu.core_type = #tpu.core_type<tc>, window_params = [{transform_indices = @transform_0, window_bounds = array<i64: 1, 16, 128>}, {transform_indices = @transform_1, window_bounds = array<i64: 1, 16, 8, 16>}, {pipeline_mode = #tpu.pipeline_mode<synchronous>, transform_indices = @transform_2, window_bounds = array<i64: 16, 1>}, {pipeline_mode = #tpu.pipeline_mode<synchronous>, transform_indices = @transform_3, window_bounds = array<i64: 8, 16>}, {pipeline_mode = #tpu.pipeline_mode<synchronous>, transform_indices = @transform_4, window_bounds = array<i64: 8, 16>}, {pipeline_mode = #tpu.pipeline_mode<synchronous>, transform_indices = @transform_5, window_bounds = array<i64: 8, 16>}, {pipeline_mode = #tpu.pipeline_mode<synchronous>, transform_indices = @transform_6, window_bounds = array<i64: 16, 8>}, {pipeline_mode = #tpu.pipeline_mode<synchronous>, transform_indices = @transform_7, window_bounds = array<i64: 16, 8>}, {pipeline_mode = #tpu.pipeline_mode<synchronous>, transform_indices = @transform_8, window_bounds = array<i64: 16, 1>}, {transform_indices = @transform_9, window_bounds = array<i64: 1, 16, 128>}]} {
    %c0 = arith.constant 0 : index
    %c0_0 = arith.constant 0 : index
    %c0_1 = arith.constant 0 : index
    %0 = vector.load %arg1[%c0, %c0_0, %c0_1] : memref<1x16x128xf32, #tpu.memory_space<vmem>>, vector<1x16x128xf32>
    %1 = vector.shape_cast %0 : vector<1x16x128xf32> to vector<16x128xf32>
    %c0_2 = arith.constant 0 : index
    %c0_3 = arith.constant 0 : index
    %c0_4 = arith.constant 0 : index
    %c0_5 = arith.constant 0 : index
    %2 = vector.load %arg2[%c0_2, %c0_3, %c0_4, %c0_5] : memref<1x16x8x16xf32, #tpu.memory_space<vmem>>, vector<1x16x8x16xf32>
    %3 = vector.shape_cast %2 : vector<1x16x8x16xf32> to vector<16x8x16xf32>
    %c0_6 = arith.constant 0 : index
    %c0_7 = arith.constant 0 : index
    %4 = vector.load %arg3[%c0_6, %c0_7] : memref<16x1xf32, #tpu.memory_space<vmem>>, vector<16x1xf32>
    %5 = vector.shape_cast %4 : vector<16x1xf32> to vector<16x1x1xf32>
    %6 = vector.broadcast %5 : vector<16x1x1xf32> to vector<16x8x16xf32>
    %7 = arith.mulf %3, %6 : vector<16x8x16xf32>
    %cst = arith.constant dense<0.000000e+00> : vector<8x16xf32>
    %8 = vector.multi_reduction <add>, %7, %cst [0] : vector<16x8x16xf32> to vector<8x16xf32>
    %cst_8 = arith.constant dense<0xFF800000> : vector<8xf32>
    %9 = vector.multi_reduction <maximumf>, %8, %cst_8 [1] : vector<8x16xf32> to vector<8xf32>
    %10 = vector.shape_cast %9 : vector<8xf32> to vector<8x1xf32>
    %11 = vector.broadcast %10 : vector<8x1xf32> to vector<8x16xf32>
    %12 = arith.subf %8, %11 : vector<8x16xf32>
    %13 = math.exp %12 : vector<8x16xf32>
    %cst_9 = arith.constant dense<0.000000e+00> : vector<8xf32>
    %14 = vector.multi_reduction <add>, %13, %cst_9 [1] : vector<8x16xf32> to vector<8xf32>
    %15 = vector.shape_cast %14 : vector<8xf32> to vector<8x1xf32>
    %16 = vector.broadcast %15 : vector<8x1xf32> to vector<8x16xf32>
    %17 = arith.divf %13, %16 : vector<8x16xf32>
    %cst_10 = arith.constant dense<0xFF800000> : vector<16xf32>
    %18 = vector.multi_reduction <maximumf>, %8, %cst_10 [0] : vector<8x16xf32> to vector<16xf32>
    %19 = vector.shape_cast %18 : vector<16xf32> to vector<1x16xf32>
    %20 = vector.broadcast %19 : vector<1x16xf32> to vector<8x16xf32>
    %21 = arith.subf %8, %20 : vector<8x16xf32>
    %22 = math.exp %21 : vector<8x16xf32>
    %cst_11 = arith.constant dense<0.000000e+00> : vector<16xf32>
    %23 = vector.multi_reduction <add>, %22, %cst_11 [0] : vector<8x16xf32> to vector<16xf32>
    %24 = vector.shape_cast %23 : vector<16xf32> to vector<1x16xf32>
    %25 = vector.broadcast %24 : vector<1x16xf32> to vector<8x16xf32>
    %26 = arith.divf %22, %25 : vector<8x16xf32>
    %27 = vector.shape_cast %17 : vector<8x16xf32> to vector<1x8x16xf32>
    %28 = vector.broadcast %27 : vector<1x8x16xf32> to vector<16x8x16xf32>
    %29 = arith.mulf %3, %28 : vector<16x8x16xf32>
    %cst_12 = arith.constant dense<0.000000e+00> : vector<16x8xf32>
    %30 = vector.multi_reduction <add>, %29, %cst_12 [2] : vector<16x8x16xf32> to vector<16x8xf32>
    %31 = vector.shape_cast %26 : vector<8x16xf32> to vector<1x8x16xf32>
    %32 = vector.broadcast %31 : vector<1x8x16xf32> to vector<16x8x16xf32>
    %33 = arith.mulf %3, %32 : vector<16x8x16xf32>
    %cst_13 = arith.constant dense<0.000000e+00> : vector<16x16xf32>
    %34 = vector.multi_reduction <add>, %33, %cst_13 [1] : vector<16x8x16xf32> to vector<16x16xf32>
    %c0_14 = arith.constant 0 : index
    %c0_15 = arith.constant 0 : index
    %35 = vector.load %arg4[%c0_14, %c0_15] : memref<8x16xf32, #tpu.memory_space<vmem>>, vector<8x16xf32>
    %cst_16 = arith.constant dense<0.000000e+00> : vector<8x8xf32>
    %36 = tpu.matmul %35, %30, %cst_16 {dimension_numbers = #tpu.dot_dimension_numbers<[1], [0], [0], [1], [0, 0, 1, 1], [], []>} : vector<8x16xf32>, vector<16x8xf32>, vector<8x8xf32> -> vector<8x8xf32>
    %c0_17 = arith.constant 0 : index
    %c0_18 = arith.constant 0 : index
    %37 = vector.load %arg5[%c0_17, %c0_18] : memref<8x16xf32, #tpu.memory_space<vmem>>, vector<8x16xf32>
    %cst_19 = arith.constant dense<0.000000e+00> : vector<8x16xf32>
    %38 = tpu.matmul %37, %34, %cst_19 {dimension_numbers = #tpu.dot_dimension_numbers<[1], [0], [0], [1], [0, 0, 1, 1], [], []>} : vector<8x16xf32>, vector<16x16xf32>, vector<8x16xf32> -> vector<8x16xf32>
    %c0_20 = arith.constant 0 : index
    %c0_21 = arith.constant 0 : index
    %39 = vector.load %arg6[%c0_20, %c0_21] : memref<8x16xf32, #tpu.memory_space<vmem>>, vector<8x16xf32>
    %cst_22 = arith.constant dense<0.000000e+00> : vector<8x128xf32>
    %40 = tpu.matmul %39, %1, %cst_22 {dimension_numbers = #tpu.dot_dimension_numbers<[1], [0], [0], [1], [0, 0, 1, 1], [], []>} : vector<8x16xf32>, vector<16x128xf32>, vector<8x128xf32> -> vector<8x128xf32>
    %41 = tpu.concatenate %36, %38 in 1 : vector<8x8xf32>, vector<8x16xf32> -> vector<8x24xf32>
    %42 = tpu.transpose %41, [1, 0] : vector<8x24xf32> -> vector<24x8xf32>
    %cst_23 = arith.constant dense<0.000000e+00> : vector<24x128xf32>
    %43 = tpu.matmul %42, %40, %cst_23 {dimension_numbers = #tpu.dot_dimension_numbers<[1], [0], [0], [1], [0, 0, 1, 1], [], []>} : vector<24x8xf32>, vector<8x128xf32>, vector<24x128xf32> -> vector<24x128xf32>
    %44 = vector.extract_strided_slice %43 {offsets = [0, 0], sizes = [8, 128], strides = [1, 1]} : vector<24x128xf32> to vector<8x128xf32>
    %cst_24 = arith.constant dense<0xFF800000> : vector<128xf32>
    %45 = vector.multi_reduction <maximumf>, %44, %cst_24 [0] : vector<8x128xf32> to vector<128xf32>
    %46 = vector.shape_cast %45 : vector<128xf32> to vector<1x128xf32>
    %47 = vector.broadcast %46 : vector<1x128xf32> to vector<8x128xf32>
    %48 = arith.subf %44, %47 : vector<8x128xf32>
    %49 = math.exp %48 : vector<8x128xf32>
    %cst_25 = arith.constant dense<0.000000e+00> : vector<128xf32>
    %50 = vector.multi_reduction <add>, %49, %cst_25 [0] : vector<8x128xf32> to vector<128xf32>
    %51 = vector.shape_cast %50 : vector<128xf32> to vector<1x128xf32>
    %52 = vector.broadcast %51 : vector<1x128xf32> to vector<8x128xf32>
    %53 = arith.divf %49, %52 : vector<8x128xf32>
    %54 = vector.extract_strided_slice %43 {offsets = [8, 0], sizes = [16, 128], strides = [1, 1]} : vector<24x128xf32> to vector<16x128xf32>
    %cst_26 = arith.constant dense<0xFF800000> : vector<128xf32>
    %55 = vector.multi_reduction <maximumf>, %54, %cst_26 [0] : vector<16x128xf32> to vector<128xf32>
    %56 = vector.shape_cast %55 : vector<128xf32> to vector<1x128xf32>
    %57 = vector.broadcast %56 : vector<1x128xf32> to vector<16x128xf32>
    %58 = arith.subf %54, %57 : vector<16x128xf32>
    %59 = math.exp %58 : vector<16x128xf32>
    %cst_27 = arith.constant dense<0.000000e+00> : vector<128xf32>
    %60 = vector.multi_reduction <add>, %59, %cst_27 [0] : vector<16x128xf32> to vector<128xf32>
    %61 = vector.shape_cast %60 : vector<128xf32> to vector<1x128xf32>
    %62 = vector.broadcast %61 : vector<1x128xf32> to vector<16x128xf32>
    %63 = arith.divf %59, %62 : vector<16x128xf32>
    %64 = tpu.concatenate %53, %63 in 0 : vector<8x128xf32>, vector<16x128xf32> -> vector<24x128xf32>
    %c0_28 = arith.constant 0 : index
    %c0_29 = arith.constant 0 : index
    %65 = vector.load %arg7[%c0_28, %c0_29] : memref<16x8xf32, #tpu.memory_space<vmem>>, vector<16x8xf32>
    %cst_30 = arith.constant dense<0.000000e+00> : vector<16x8xf32>
    %66 = tpu.matmul %65, %36, %cst_30 {dimension_numbers = #tpu.dot_dimension_numbers<[1], [0], [0], [1], [0, 0, 1, 1], [], []>} : vector<16x8xf32>, vector<8x8xf32>, vector<16x8xf32> -> vector<16x8xf32>
    %c0_31 = arith.constant 0 : index
    %c0_32 = arith.constant 0 : index
    %67 = vector.load %arg8[%c0_31, %c0_32] : memref<16x8xf32, #tpu.memory_space<vmem>>, vector<16x8xf32>
    %cst_33 = arith.constant dense<0.000000e+00> : vector<16x16xf32>
    %68 = tpu.matmul %67, %38, %cst_33 {dimension_numbers = #tpu.dot_dimension_numbers<[1], [0], [0], [1], [0, 0, 1, 1], [], []>} : vector<16x8xf32>, vector<8x16xf32>, vector<16x16xf32> -> vector<16x16xf32>
    %69 = tpu.concatenate %66, %68 in 1 : vector<16x8xf32>, vector<16x16xf32> -> vector<16x24xf32>
    %cst_34 = arith.constant dense<0.000000e+00> : vector<16x128xf32>
    %70 = tpu.matmul %69, %64, %cst_34 {dimension_numbers = #tpu.dot_dimension_numbers<[1], [0], [0], [1], [0, 0, 1, 1], [], []>} : vector<16x24xf32>, vector<24x128xf32>, vector<16x128xf32> -> vector<16x128xf32>
    %c0_35 = arith.constant 0 : index
    %c0_36 = arith.constant 0 : index
    %71 = vector.load %arg9[%c0_35, %c0_36] : memref<16x1xf32, #tpu.memory_space<vmem>>, vector<16x1xf32>
    %72 = vector.broadcast %71 : vector<16x1xf32> to vector<16x128xf32>
    %73 = arith.addf %70, %72 : vector<16x128xf32>
    %74 = arith.addf %1, %73 : vector<16x128xf32>
    %cst_37 = arith.constant 0.000000e+00 : f32
    %75 = vector.broadcast %cst_37 : f32 to vector<16x128xf32>
    %76 = arith.cmpf oge, %74, %75 : vector<16x128xf32>
    %cst_38 = arith.constant 2.000000e-01 : f32
    %77 = vector.broadcast %cst_38 : f32 to vector<16x128xf32>
    %78 = arith.mulf %77, %74 : vector<16x128xf32>
    %79 = arith.select %76, %74, %78 : vector<16x128xi1>, vector<16x128xf32>
    %c0_39 = arith.constant 0 : index
    %c0_40 = arith.constant 0 : index
    %c0_41 = arith.constant 0 : index
    %80 = vector.load %arg10[%c0_39, %c0_40, %c0_41] : memref<1x16x128xf32, #tpu.memory_space<vmem>>, vector<1x16x128xf32>
    %81 = vector.shape_cast %80 : vector<1x16x128xf32> to vector<16x128xf32>
    %82 = vector.shape_cast %79 : vector<16x128xf32> to vector<1x16x128xf32>
    tpu.vector_store %arg10[%c0_39, %c0_40, %c0_41], %82 {strides = array<i32>} : memref<1x16x128xf32, #tpu.memory_space<vmem>>, vector<1x16x128xf32>,
    return
  }
  func.func @transform_0(%arg0: i32) -> (i32, i32, i32) {
    %c0_i32 = arith.constant 0 : i32
    %c0_i32_0 = arith.constant 0 : i32
    %c0_i32_1 = arith.constant 0 : i32
    return %arg0, %c0_i32, %c0_i32_0 : i32, i32, i32
  }
  func.func @transform_1(%arg0: i32) -> (i32, i32, i32, i32) {
    %c0_i32 = arith.constant 0 : i32
    %c0_i32_0 = arith.constant 0 : i32
    %c0_i32_1 = arith.constant 0 : i32
    %c0_i32_2 = arith.constant 0 : i32
    return %arg0, %c0_i32, %c0_i32_0, %c0_i32_1 : i32, i32, i32, i32
  }
  func.func @transform_2(%arg0: i32) -> (i32, i32) {
    %c0_i32 = arith.constant 0 : i32
    %c0_i32_0 = arith.constant 0 : i32
    %c0_i32_1 = arith.constant 0 : i32
    return %c0_i32, %c0_i32_0 : i32, i32
  }
  func.func @transform_3(%arg0: i32) -> (i32, i32) {
    %c0_i32 = arith.constant 0 : i32
    %c0_i32_0 = arith.constant 0 : i32
    %c0_i32_1 = arith.constant 0 : i32
    return %c0_i32, %c0_i32_0 : i32, i32
  }
  func.func @transform_4(%arg0: i32) -> (i32, i32) {
    %c0_i32 = arith.constant 0 : i32
    %c0_i32_0 = arith.constant 0 : i32
    %c0_i32_1 = arith.constant 0 : i32
    return %c0_i32, %c0_i32_0 : i32, i32
  }
  func.func @transform_5(%arg0: i32) -> (i32, i32) {
    %c0_i32 = arith.constant 0 : i32
    %c0_i32_0 = arith.constant 0 : i32
    %c0_i32_1 = arith.constant 0 : i32
    return %c0_i32, %c0_i32_0 : i32, i32
  }
  func.func @transform_6(%arg0: i32) -> (i32, i32) {
    %c0_i32 = arith.constant 0 : i32
    %c0_i32_0 = arith.constant 0 : i32
    %c0_i32_1 = arith.constant 0 : i32
    return %c0_i32, %c0_i32_0 : i32, i32
  }
  func.func @transform_7(%arg0: i32) -> (i32, i32) {
    %c0_i32 = arith.constant 0 : i32
    %c0_i32_0 = arith.constant 0 : i32
    %c0_i32_1 = arith.constant 0 : i32
    return %c0_i32, %c0_i32_0 : i32, i32
  }
  func.func @transform_8(%arg0: i32) -> (i32, i32) {
    %c0_i32 = arith.constant 0 : i32
    %c0_i32_0 = arith.constant 0 : i32
    %c0_i32_1 = arith.constant 0 : i32
    return %c0_i32, %c0_i32_0 : i32, i32
  }
  func.func @transform_9(%arg0: i32) -> (i32, i32, i32) {
    %c0_i32 = arith.constant 0 : i32
    %c0_i32_0 = arith.constant 0 : i32
    %c0_i32_1 = arith.constant 0 : i32
    return %arg0, %c0_i32, %c0_i32_0 : i32, i32, i32
  }
}

</mosaic_0001>

<bundles_post_ra>
// kernel: tpu_custom_call.1
= control target key start
LH: loop header
LB: loop body
LE: loop exit
PB: predicated region body
PF: predicated region fallthrough
CT: control target
= control target key end

     0   :  { %14 = vsyncpa [#allocation3], 0  ;;  %s2625_s0 = inlined_call_operand.vmem [shape: f32[2,16,128], index: 0, kind: input, shape index: {}]   ;;  %s2626_s1 = inlined_call_operand.hbm [shape: f32[2,16,8,16], index: 1, kind: input, shape index: {}]   ;;  %s2627_s2 = inlined_call_operand.vmem [shape: f32[16,1], index: 2, kind: input, shape index: {}]   ;;  %s2628_s3 = inlined_call_operand.vmem [shape: f32[8,16], index: 3, kind: input, shape index: {}]   ;;  %s2629_s4 = inlined_call_operand.vmem [shape: f32[8,16], index: 4, kind: input, shape index: {}]   ;;  %s2630_s5 = inlined_call_operand.vmem [shape: f32[8,16], index: 5, kind: input, shape index: {}]   ;;  %s2631_s6 = inlined_call_operand.vmem [shape: f32[16,8], index: 6, kind: input, shape index: {}]   ;;  %s2632_s7 = inlined_call_operand.vmem [shape: f32[16,8], index: 7, kind: input, shape index: {}]   ;;  %s2633_s8 = inlined_call_operand.vmem [shape: f32[16,1], index: 8, kind: input, shape index: {}]   ;;  %s2634_s9 = inlined_call_operand.hbm [shape: f32[2,16,128], index: 9, kind: output, shape index: {}]  }
   0x1   :  { %16 = vsyncpa [#allocation3 + $0x1], 0 }
   0x2   :  { %17 = vsyncpa [#allocation4], 0 }
   0x3   :  { %19 = vsyncpa [#allocation4 + $0x1], 0  ;;  %s2148_s30 = smov 0   ;;  %s2150_s10 = smov 0  }
   0x4   :  { %s2152_s11 = smov 0   ;;  %s2154_s12 = smov 0  }
   0x5 LB: > { %s2169_s13 = sadd.s32 4294967295, %s2085_s12   ;;  %s1793_s14 = sadd.s32 4294967294, %s2085_s12   ;;  %s2085_s12 = sphi %s2154_s12, %s2647_s12   ;;  %s2081_s11 = sphi %s2152_s11, %s2646_s11   ;;  %s2077_s10 = sphi %s2150_s10, %s2645_s10   ;;  %s2073_s30 = sphi %s2148_s30, %s2644_s30  }
   0x6   : > { %s2173_s15 = sadd.s32 1, %s2085_s12   ;;  %s58_s16 = sadd.s32 1, %s2081_s11 }
   0x7   : > { %s55_s17 = ssub.s32 %s2085_s12, %s2173_s15  ;;  %p65_p0 = scmp.ne.s32.totalorder %s2081_s11, %s2077_s10 }
   0x8   : > { %p56_p1 = scmp.eq.s32.totalorder %s55_s17, 0  ;;  %p66_p2 = scmp.eq.s32.totalorder %s2085_s12, 0 }
   0x9   : > { %p71_p3 = scmp.ne.s32.totalorder %s2077_s10, %s2073_s30  ;;  %p72_p4 = scmp.eq.s32.totalorder %s2169_s13, 0 }
   0xa   : > { %s2185_s18 = scalar_select %p56_p1, %s2081_s11, %s58_s16  }
   0xb   : > { %p2187_p5 = por %p66_p2, %p65_p0  ;;  %p2191_p6 = por %p72_p4, %p71_p3 }
   0xc   : > { %p242_p7 = scmp.eq.s32.totalorder %s2169_s13, 1  ;;  %p248_p8 = scmp.eq.s32.totalorder %s1793_s14, 1 }
   0xd   : > { %p1924_p10 = scmp.lt.s32.totalorder %s2085_s12, 2  ;;  %s297_s23 = sand.u32 1, %s2081_s11  }
   0xe   : > { %p2198_p11 = por %p242_p7, %p65_p0  ;;  %p2202_p12 = por %p248_p8, %p71_p3 }
   0xf   : > { %s1821_s24 = sshll.u32 %s2085_s12, 11  ;;  %s1796_s25 = sshll.u32 %s297_s23, 7 }
  0x10   : > { %s2638_s21 = scalar_select %p2198_p11, 1, 0 }
  0x11   : > { %s2639_s22 = scalar_select %p2202_p12, 1, 0 }
  0x12   : > { %s2211_s28 = scalar_lea.hbm %s2626_s1, %s1821_s24  ;;  %s301_s29 = scalar_lea.vmem [#allocation2], %s1796_s25 }
  0x13   : > { %s308_s14 = sshll.u32 %s301_s29, 4  ;;  %p2215_p13 = pnand %p1924_p10, %p2187_p5  ;;  %s2219_s14 = int_to_ptr.vmem [resolvable:$true] %s308_s14 }
  0x14   : > { %s2221_s17 = scalar_lea.sflag [#allocation3], %s297_s23  ;;  %s1989_s26 = scalar_lea.hbm %s2211_s28, 2048 }
  0x15   : > { %p1990_p0 = scmp.ne.s32.totalorder %s2211_s28, %s1989_s26  ;;  %p1991_p1 = pneg %p2215_p13 }
  0x16   : > { %s1994_s25 = scalar_lea.hbm %s2626_s1, 4096  ;;  %p1995_p4 = scmp.lt.u32.totalorder %s2211_s28, %s2626_s1 }
  0x17   : > { %p1992_p2 = pnand %p1991_p1, %p1990_p0  ;;  %p1996_p5 = scmp.lt.u32.totalorder %s1994_s25, %s1989_s26 }
  0x18   : > { %p1998_p8 = scmp.lt.u32.totalorder %s1989_s26, %s2211_s28 }
  0x19   : > { %p1993_p3 = pneg %p1992_p2  ;;  %p1997_p7 = por %p1996_p5, %p1995_p4 }
  0x1b   : > { %p1999_p10 = por %p1998_p8, %p1997_p7 }
  0x1d   : > { %p2000_p9 = pnand %p1999_p10, %p1993_p3 }
  0x1f   : > { %2003 = shalt.err (!%p2000_p9)
}
  0x20   : > { %s2004_s23 = scalar_lea.vmem %s2219_s14, 2048  ;;  %s2087_s24 = smov [#allocation2]  }
  0x21   : > { %p2005_p0 = scmp.ne.s32.totalorder %s2219_s14, %s2004_s23  ;;  %s2009_s19 = sshll.u32 %s2087_s24, 4  ;;  %s2010_s19 = int_to_ptr.vmem [resolvable:$false] %s2009_s19 }
  0x22   : > { %s2011_s27 = scalar_lea.vmem %s2010_s19, 4096  ;;  %p2012_p11 = scmp.lt.s32.totalorder %s2219_s14, %s2010_s19 }
  0x23   : > { %p2007_p2 = pnand %p2005_p0, %p1991_p1  ;;  %p2013_p4 = scmp.lt.s32.totalorder %s2011_s27, %s2004_s23 }
  0x25   : > { %p2008_p12 = pneg %p2007_p2  ;;  %p2014_p5 = por %p2013_p4, %p2012_p11 }
  0x27   : > { %p2015_p7 = pnand %p2014_p5, %p2008_p12 }
  0x29   : > { %2018 = shalt.err (!%p2015_p7)
}
  0x2a   : > { %s2088_s26 = smov 128   ;;  %s2089_s25 = smov 8  }
  0x2b   : > { %1919 = dma.hbm_to_vmem [thread:$0]  (!%p2215_p13), %s2211_s28, 2048, %s2219_s14, %s2221_s17, %s2088_s26, %s2088_s26, %s2089_s25  }
  0x2c   : > { %p1799_p9 = scmp.ge.s32.totalorder %s2085_s12, 1  ;;  %p316_p1 = scmp.lt.s32.totalorder %s2085_s12, 3 }
  0x2e   : > { %p317_p3 = pnand %p1799_p9, %p316_p1 }
  0x2f   : > { %s2252_s29 = sand.u32 (!%p317_p3), 1, %s2077_s10  }
  0x30   : > { %320 = sbr.rel (%p317_p3) target bundleno = 1595 (0x63b), region = 56  ;;  %s1800_s23 = sshll.u32 (!%p317_p3), %s2252_s29, 7 }
  0x31   : > { %s323_s24 = scalar_lea.sflag (!%p317_p3), [#allocation3], %s2252_s29  ;;  %s2256_s19 = scalar_lea.vmem (!%p317_p3), [#allocation2], %s1800_s23 }
  0x37   : > { %2064 = dma.done.wait (%p2191_p6), %s323_s24, 2048  }
  0x38   : > { %2066 = vsyncadd (%p2191_p6), %s323_s24, 4294965248  ;;  %v397_v0 = vlaneseq  ;;  %v2090_v1 = vmov 0   ;;  %v2091_v2 = vmov 1966171168   ;;  %v389_v9 = vld [vmem:[%s2627_s2] sm:$0xff]  ;;  %v390_v20 = vld [vmem:[%s2627_s2 + $0x8] sm:$0xff] }
  0x39   : > { %1967 = vset.pattern.permute.xlu0 %v2090_v1  ;;  %v395_v3 = vunpack.c.l.s4 %v2091_v2  ;;  %1968 = vset.pattern.permute.xlu1 %v2090_v1  ;;  %v393_v12 = vcombine.high %v389_v9, %v389_v9  ;;  %v442_v33 = vcombine.high %v390_v20, %v390_v20  ;;  %v2092_v54 = vmov 0.0|0.0   ;;  %v2273_v56 = vld [vmem:[%s2256_s19] sm:$0xff]  ;;  %v2276_v58 = vld [vmem:[%s2256_s19 + $0x10] sm:$0xff]  ;;  %v2279_v59 = vld [vmem:[%s2256_s19 + $0x8] sm:$0xff]  ;;  %s2095_s26 = smov 8   ;;  %p366_p6 = scmp.lt.s32.totalorder %s2169_s13, 1 }
  0x3a   : > { %v398_v4 = vshrl.u32 %v397_v0, 7  ;;  %v906_v5 = vand.u32 127, %v397_v0  ;;  %1902 = vmatprep.subr.bf16.mxu1 %v2092_v54  ;;  %1899 = vmatprep.subr.bf16.mxu0 %v2092_v54  ;;  %vm635_vm0 = vcmask 130048   ;;  %v2283_v62 = vld [vmem:[%s2256_s19 + $0x18] sm:$0xff]  ;;  %v2288_v2 = vld [vmem:[%s2256_s19 + $0x20] sm:$0xff]  ;;  %vm971_vm1 = vcmask 1041409  }
  0x3b   : > { %v396_v6 = vunpack.c.0.s8 %v395_v3  ;;  %vm973_vm2 = vcmask 1042434   ;;  %vm975_vm3 = vcmask 1043459   ;;  %vm977_vm4 = vcmask 1044484   ;;  %s367_s25 = scalar_select %p366_p6, %s2169_s13, 1 }
  0x3c   : > { %v2262_v7 = vsub.s32 %v906_v5, %v398_v4  ;;  %v493_v11 = vsub.s32 0, %v398_v4  ;;  %vm979_vm5 = vcmask 1045509   ;;  %vm981_vm6 = vcmask 1046534   ;;  %s1695_s17 = scalar_lea.sflag [#allocation4], %s2252_s29  ;;  %p2641_p12 = scmp.ne.s32.totalorder %s2638_s21, 0 }
  0x3d   : > { %v399_v8 = vsub.s32 %v396_v6, %v398_v4  ;;  %vm983_vm7 = vcmask 1047559   ;;  %vm2093_vm8 = vmmov 0   ;;  %s1822_s23 = sshll.u32 %s367_s25, 4  ;;  %vm1251_vm9 = vcmask 64512   ;;  %s2096_s27 = smov [#allocation5]  }
  0x3e   : > { %s370_s28 = scalar_lea.vmem %s2625_s0, %s1822_s23  ;;  %vm1602_vm10 = vcmask 195584   ;;  %s1801_s23 = sshll.u32 %s2252_s29, 4 }
  0x3f   : > { %v400_v10 = vrot.slane %v389_v9, %v399_v8  ;;  %v407_v15 = vrot.slane %v393_v12, %v399_v8  ;;  %v449_v27 = vrot.slane %v390_v20, %v399_v8  ;;  %v456_v38 = vrot.slane %v442_v33, %v399_v8  ;;  %v2294_v9 = vld [vmem:[%s2256_s19 + $0x28] sm:$0xff]  ;;  %s365_s24 = scalar_lea.vmem [#allocation5], %s1801_s23  ;;  %s2023_s25 = sshll.u32 %s2096_s27, 4  ;;  %s2024_s25 = int_to_ptr.vmem [resolvable:$false] %s2023_s25 }
  0x40   : > { %s2025_s23 = scalar_lea.vmem %s2024_s25, 512 }
  0x41   : > { %v416_v13 = vrot.slane %v400_v10, %v399_v8  ;;  %v408_v14 = vcombine.high %v400_v10, %v400_v10  ;;  %v409_v19 = vcombine.high %v407_v15, %v407_v15  ;;  %v423_v24 = vrot.slane %v407_v15, %v399_v8 }
  0x42   : > { %v457_v32 = vcombine.high %v449_v27, %v449_v27  ;;  %v465_v35 = vrot.slane %v449_v27, %v399_v8  ;;  %v458_v43 = vcombine.high %v456_v38, %v456_v38  ;;  %v472_v45 = vrot.slane %v456_v38, %v399_v8 }
  0x43   : > { %v494_v16 = vrot.slane %v416_v13, %v493_v11  ;;  %v438_v17 = vcombine.high %v416_v13, %v416_v13  ;;  %v430_v18 = vrot.slane %v408_v14, %v399_v8  ;;  %v437_v26 = vrot.slane %v409_v19, %v399_v8  ;;  %v2299_v14 = vld [vmem:[%s2256_s19 + $0x30] sm:$0xff]  ;;  %v2304_v19 = vld [vmem:[%s2256_s19 + $0x38] sm:$0xff] }
  0x44   : > { %v510_v28 = vrot.slane %v423_v24, %v493_v11  ;;  %v439_v29 = vcombine.high %v423_v24, %v423_v24  ;;  %v479_v37 = vrot.slane %v457_v32, %v399_v8  ;;  %v526_v39 = vrot.slane %v465_v35, %v493_v11  ;;  %v2309_v24 = vld [vmem:[%s2256_s19 + $0x40] sm:$0xff] }
  0x45   : > { %556 = vperm.xlu0 %1967, %v494_v16   ;;  %v502_v21 = vrot.slane %v438_v17, %v493_v11  ;;  %v498_v22 = vrot.slane %v430_v18, %v493_v11  ;;  %v440_v23 = vcombine.high %v430_v18, %v430_v18  ;;  %v514_v30 = vrot.slane %v437_v26, %v493_v11 }
  0x46   : > { %v441_v31 = vcombine.high %v437_v26, %v437_v26  ;;  %v518_v34 = vrot.slane %v439_v29, %v493_v11  ;;  %v487_v40 = vcombine.high %v465_v35, %v465_v35  ;;  %v530_v41 = vrot.slane %v479_v37, %v493_v11  ;;  %v2314_v29 = vld [vmem:[%s2256_s19 + $0x48] sm:$0xff] }
  0x47   : > { %564 = vperm.xlu1 %1968, %v502_v21   ;;  %v506_v25 = vrot.slane %v440_v23, %v493_v11  ;;  %v489_v42 = vcombine.high %v479_v37, %v479_v37  ;;  %v486_v47 = vrot.slane %v458_v43, %v399_v8  ;;  %v542_v48 = vrot.slane %v472_v45, %v493_v11 }
  0x48   : > { %v522_v36 = vrot.slane %v441_v31, %v493_v11  ;;  %v534_v44 = vrot.slane %v487_v40, %v493_v11  ;;  %v488_v49 = vcombine.high %v472_v45, %v472_v45 }
  0x49   : > { %560 = vperm.xlu0 %1967, %v498_v22   ;;  %v538_v46 = vrot.slane %v489_v42, %v493_v11  ;;  %v546_v50 = vrot.slane %v486_v47, %v493_v11  ;;  %v490_v51 = vcombine.high %v486_v47, %v486_v47 }
  0x4a   : > { %v550_v52 = vrot.slane %v488_v49, %v493_v11  ;;  %v2334_v49 = vld [vmem:[%s2256_s19 + $0x68] sm:$0xff] }
  0x4b   : > { %568 = vperm.xlu1 %1968, %v506_v25   ;;  %v554_v53 = vrot.slane %v490_v51, %v493_v11 }
  0x4d   : > { %572 = vperm.xlu0 %1967, %v510_v28  }
  0x4f   : > { %576 = vperm.xlu1 %1968, %v514_v30  }
  0x51   : > { %580 = vperm.xlu0 %1967, %v518_v34   ;;  %v2319_v34 = vld [vmem:[%s2256_s19 + $0x50] sm:$0xff] }
  0x53   : > { %584 = vperm.xlu1 %1968, %v522_v36  }
  0x55   : > { %588 = vperm.xlu0 %1967, %v526_v39   ;;  %v2324_v39 = vld [vmem:[%s2256_s19 + $0x58] sm:$0xff] }
  0x57   : > { %592 = vperm.xlu1 %1968, %v530_v41  }
  0x59   : > { %596 = vperm.xlu0 %1967, %v534_v44   ;;  %v2329_v44 = vld [vmem:[%s2256_s19 + $0x60] sm:$0xff] }
  0x5b   : > { %600 = vperm.xlu1 %1968, %v538_v46  }
  0x5d   : > { %604 = vperm.xlu0 %1967, %v542_v48  }
  0x5f   : > { %608 = vperm.xlu1 %1968, %v546_v50  }
  0x61   : > { %612 = vperm.xlu0 %1967, %v550_v52  }
  0x63   : > { %616 = vperm.xlu1 %1968, %v554_v53  }
  0xc4   : > { %v557_v55 = vpop.permute.xlu0 %556 }
  0xc5   : > { %v619_v60 = vmul.f32 %v557_v55, %v2273_v56  ;;  %v2339_v55 = vld [vmem:[%s2256_s19 + $0x70] sm:$0xff] }
  0xc6   : > { %v565_v57 = vpop.permute.xlu1 %564 }
  0xc7   : > { %v621_v63 = vmul.f32 %v565_v57, %v2276_v58  ;;  %v636_v3 = vsel %vm635_vm0, %v619_v60, 0.0 }
  0xc8   : > { %v561_v61 = vpop.permute.xlu0 %560 }
  0xc9   : > { %v620_v0 = vmul.f32 %v561_v61, %v2279_v59  ;;  %v639_v10 = vsel %vm635_vm0, %v621_v63, 0.0 }
  0xca   : > { %v569_v1 = vpop.permute.xlu1 %568 }
  0xcb   : > { %v637_v4 = vsel %vm635_vm0, %v620_v0, 0.0  ;;  %v622_v5 = vmul.f32 %v569_v1, %v2283_v62  ;;  %v2344_v0 = vld [vmem:[%s2256_s19 + $0x78] sm:$0xff]  ;;  %s1708_s19 = sshll.u32 %s365_s24, 4  ;;  %s2575_s19 = int_to_ptr.vmem [resolvable:$true] %s1708_s19 }
  0xcc   : > { %v638_v6 = vadd.f32 %v637_v4, %v636_v3  ;;  %v573_v8 = vpop.permute.xlu0 %572  ;;  %p2026_p10 = scmp.lt.s32.totalorder %s2575_s19, %s2024_s25 }
  0xcd   : > { %v623_v11 = vmul.f32 %v573_v8, %v2288_v2  ;;  %v641_v15 = vsel %vm635_vm0, %v622_v5, 0.0 }
  0xce   : > { %v640_v12 = vadd.f32 %v639_v10, %v638_v6  ;;  %v577_v13 = vpop.permute.xlu1 %576 }
  0xcf   : > { %v624_v16 = vmul.f32 %v577_v13, %v2294_v9  ;;  %v643_v20 = vsel %vm635_vm0, %v623_v11, 0.0 }
  0xd0   : > { %v642_v17 = vadd.f32 %v641_v15, %v640_v12  ;;  %v581_v18 = vpop.permute.xlu0 %580 }
  0xd1   : > { %v625_v21 = vmul.f32 %v581_v18, %v2299_v14  ;;  %v645_v25 = vsel %vm635_vm0, %v624_v16, 0.0 }
  0xd2   : > { %v644_v22 = vadd.f32 %v643_v20, %v642_v17  ;;  %v585_v23 = vpop.permute.xlu1 %584 }
  0xd3   : > { %v626_v26 = vmul.f32 %v585_v23, %v2304_v19  ;;  %v647_v30 = vsel %vm635_vm0, %v625_v21, 0.0 }
  0xd4   : > { %v646_v27 = vadd.f32 %v645_v25, %v644_v22  ;;  %v589_v28 = vpop.permute.xlu0 %588 }
  0xd5   : > { %v627_v31 = vmul.f32 %v589_v28, %v2309_v24  ;;  %v649_v35 = vsel %vm635_vm0, %v626_v26, 0.0 }
  0xd6   : > { %v648_v32 = vadd.f32 %v647_v30, %v646_v27  ;;  %v593_v33 = vpop.permute.xlu1 %592 }
  0xd7   : > { %v628_v36 = vmul.f32 %v593_v33, %v2314_v29  ;;  %v651_v40 = vsel %vm635_vm0, %v627_v31, 0.0 }
  0xd8   : > { %v650_v37 = vadd.f32 %v649_v35, %v648_v32  ;;  %v597_v38 = vpop.permute.xlu0 %596 }
  0xd9   : > { %v629_v41 = vmul.f32 %v597_v38, %v2319_v34  ;;  %v653_v45 = vsel %vm635_vm0, %v628_v36, 0.0 }
  0xda   : > { %v652_v42 = vadd.f32 %v651_v40, %v650_v37  ;;  %v601_v43 = vpop.permute.xlu1 %600 }
  0xdb   : > { %v630_v46 = vmul.f32 %v601_v43, %v2324_v39  ;;  %v655_v50 = vsel %vm635_vm0, %v629_v41, 0.0 }
  0xdc   : > { %v654_v47 = vadd.f32 %v653_v45, %v652_v42  ;;  %v605_v48 = vpop.permute.xlu0 %604 }
  0xdd   : > { %v631_v51 = vmul.f32 %v605_v48, %v2329_v44  ;;  %v657_v57 = vsel %vm635_vm0, %v630_v46, 0.0 }
  0xde   : > { %v656_v52 = vadd.f32 %v655_v50, %v654_v47  ;;  %v609_v53 = vpop.permute.xlu1 %608 }
  0xdf   : > { %v632_v60 = vmul.f32 %v609_v53, %v2334_v49  ;;  %v659_v1 = vsel %vm635_vm0, %v631_v51, 0.0 }
  0xe0   : > { %v658_v61 = vadd.f32 %v657_v57, %v656_v52  ;;  %v613_v63 = vpop.permute.xlu0 %612 }
  0xe1   : > { %v633_v3 = vmul.f32 %v613_v63, %v2339_v55  ;;  %v661_v6 = vsel %vm635_vm0, %v632_v60, 0.0 }
  0xe2   : > { %v660_v4 = vadd.f32 %v659_v1, %v658_v61  ;;  %v617_v5 = vpop.permute.xlu1 %616 }
  0xe3   : > { %v634_v8 = vmul.f32 %v617_v5, %v2344_v0  ;;  %v663_v11 = vsel %vm635_vm0, %v633_v3, 0.0 }
  0xe4   : > { %v662_v10 = vadd.f32 %v661_v6, %v660_v4 }
  0xe5   : > { %v665_v13 = vsel %vm635_vm0, %v634_v8, 0.0 }
  0xe6   : > { %v664_v12 = vadd.f32 %v663_v11, %v662_v10 }
  0xe8   : > { %v2352_v15 = vadd.f32 %v665_v13, %v664_v12 }
  0xea   : > { %v667_v16 = vsel %vm635_vm0, %v2352_v15, -inf }
  0xeb   : > { %668 = vmax.xlane.f32.xlu0 %v667_v16  ;;  %v678_v17 = vrot.slane %v667_v16, 4 }
  0xed   : > { %v679_v18 = vmax.f32 %v667_v16, %v678_v17 }
  0xef   : > { %v680_v20 = vrot.slane %v679_v18, 2 }
  0xf1   : > { %v681_v21 = vmax.f32 %v679_v18, %v680_v20 }
  0xf3   : > { %v682_v22 = vrot.slane %v681_v21, 1 }
  0xf5   : > { %v683_v23 = vmax.f32 %v681_v21, %v682_v22 }
  0xf7   : > { %v684_v25 = vsub.f32 %v2352_v15, %v683_v23 }
  0xf9   : > { %v685_v26 = vmul.f32 1.442695, %v684_v25 }
  0xfb   : > { %1971 = vpow2.f32 %v685_v26 }
 0x105   : > { %v1972_v27 = vpop.eup %1971 }
 0x106   : > { %v687_v28 = vsel %vm635_vm0, %v1972_v27, 0.0 }
 0x107   : > { %v688_v30 = vrot.slane %v687_v28, 4 }
 0x109   : > { %v689_v31 = vadd.f32 %v688_v30, %v687_v28 }
 0x10b   : > { %v690_v32 = vrot.slane %v689_v31, 2 }
 0x10d   : > { %v691_v33 = vadd.f32 %v690_v32, %v689_v31 }
 0x10f   : > { %v692_v35 = vrot.slane %v691_v33, 1 }
 0x111   : > { %v693_v36 = vadd.f32 %v692_v35, %v691_v33 }
 0x113   : > { %1973 = vrcp.f32 %v693_v36 }
 0x11d   : > { %v1974_v37 = vpop.eup %1973 }
 0x11e   : > { %v695_v38 = vmul.f32 %v1974_v37, %v1972_v27 }
 0x120   : > { %v760_v40 = vmul.f32 %v695_v38, %v2273_v56  ;;  %v761_v41 = vmul.f32 %v695_v38, %v2279_v59  ;;  %v762_v42 = vmul.f32 %v695_v38, %v2276_v58  ;;  %v763_v43 = vmul.f32 %v695_v38, %v2283_v62 }
 0x121   : > { %v764_v45 = vmul.f32 %v695_v38, %v2288_v2  ;;  %v765_v46 = vmul.f32 %v695_v38, %v2294_v9  ;;  %v766_v47 = vmul.f32 %v695_v38, %v2299_v14  ;;  %v767_v48 = vmul.f32 %v695_v38, %v2304_v19 }
 0x122   : > { %v776_v50 = vsel %vm635_vm0, %v760_v40, 0.0  ;;  %v783_v51 = vsel %vm635_vm0, %v761_v41, 0.0  ;;  %v790_v52 = vsel %vm635_vm0, %v762_v42, 0.0  ;;  %v797_v53 = vsel %vm635_vm0, %v763_v43, 0.0 }
 0x123   : > { %v777_v57 = vrot.slane %v776_v50, 4  ;;  %v784_v60 = vrot.slane %v783_v51, 4  ;;  %v791_v61 = vrot.slane %v790_v52, 4  ;;  %v798_v63 = vrot.slane %v797_v53, 4 }
 0x124   : > { %v804_v1 = vsel %vm635_vm0, %v764_v45, 0.0  ;;  %v811_v3 = vsel %vm635_vm0, %v765_v46, 0.0  ;;  %v818_v4 = vsel %vm635_vm0, %v766_v47, 0.0  ;;  %v825_v5 = vsel %vm635_vm0, %v767_v48, 0.0 }
 0x125   : > { %v778_v6 = vadd.f32 %v777_v57, %v776_v50  ;;  %v785_v8 = vadd.f32 %v784_v60, %v783_v51  ;;  %v792_v10 = vadd.f32 %v791_v61, %v790_v52  ;;  %v799_v11 = vadd.f32 %v798_v63, %v797_v53 }
 0x126   : > { %v805_v12 = vrot.slane %v804_v1, 4  ;;  %v812_v13 = vrot.slane %v811_v3, 4  ;;  %v819_v16 = vrot.slane %v818_v4, 4  ;;  %v826_v17 = vrot.slane %v825_v5, 4 }
 0x127   : > { %v779_v18 = vrot.slane %v778_v6, 2  ;;  %v786_v20 = vrot.slane %v785_v8, 2  ;;  %v793_v21 = vrot.slane %v792_v10, 2  ;;  %v800_v22 = vrot.slane %v799_v11, 2 }
 0x128   : > { %v806_v23 = vadd.f32 %v805_v12, %v804_v1  ;;  %v813_v25 = vadd.f32 %v812_v13, %v811_v3  ;;  %v820_v26 = vadd.f32 %v819_v16, %v818_v4  ;;  %v827_v27 = vadd.f32 %v826_v17, %v825_v5 }
 0x129   : > { %v780_v28 = vadd.f32 %v779_v18, %v778_v6  ;;  %v787_v30 = vadd.f32 %v786_v20, %v785_v8  ;;  %v794_v31 = vadd.f32 %v793_v21, %v792_v10  ;;  %v2374_v32 = vadd.f32 %v800_v22, %v799_v11 }
 0x12a   : > { %v807_v33 = vrot.slane %v806_v23, 2  ;;  %v814_v35 = vrot.slane %v813_v25, 2  ;;  %v821_v36 = vrot.slane %v820_v26, 2  ;;  %v768_v37 = vmul.f32 %v695_v38, %v2309_v24 }
 0x12b   : > { %v769_v40 = vmul.f32 %v695_v38, %v2314_v29  ;;  %v770_v41 = vmul.f32 %v695_v38, %v2319_v34  ;;  %v771_v42 = vmul.f32 %v695_v38, %v2324_v39  ;;  %v781_v43 = vrot.slane %v780_v28, 1 }
 0x12c   : > { %v788_v45 = vrot.slane %v787_v30, 1  ;;  %v795_v46 = vrot.slane %v794_v31, 1  ;;  %v828_v47 = vrot.slane %v827_v27, 2  ;;  %v772_v48 = vmul.f32 %v695_v38, %v2329_v44 }
 0x12d   : > { %v773_v50 = vmul.f32 %v695_v38, %v2334_v49  ;;  %v774_v51 = vmul.f32 %v695_v38, %v2339_v55  ;;  %v775_v52 = vmul.f32 %v695_v38, %v2344_v0  ;;  %v802_v53 = vrot.slane %v2374_v32, 1 }
 0x12e   : > { %v2385_v57 = vadd.f32 %v807_v33, %v806_v23  ;;  %v2387_v60 = vadd.f32 %v814_v35, %v813_v25  ;;  %v2389_v61 = vadd.f32 %v821_v36, %v820_v26  ;;  %v832_v63 = vsel %vm635_vm0, %v768_v37, 0.0 }
 0x12f   : > { %v839_v1 = vsel %vm635_vm0, %v769_v40, 0.0  ;;  %v846_v3 = vsel %vm635_vm0, %v770_v41, 0.0  ;;  %v853_v4 = vsel %vm635_vm0, %v771_v42, 0.0  ;;  %v782_v5 = vadd.f32 %v781_v43, %v780_v28 }
 0x130   : > { %v789_v6 = vadd.f32 %v788_v45, %v787_v30  ;;  %v2395_v8 = vadd.f32 %v795_v46, %v794_v31  ;;  %v2397_v38 = vadd.f32 %v828_v47, %v827_v27  ;;  %v833_v10 = vrot.slane %v832_v63, 4 }
 0x131   : > { %v840_v11 = vrot.slane %v839_v1, 4  ;;  %v847_v12 = vrot.slane %v846_v3, 4  ;;  %v854_v13 = vrot.slane %v853_v4, 4  ;;  %v860_v16 = vsel %vm635_vm0, %v772_v48, 0.0 }
 0x132   : > { %v867_v17 = vsel %vm635_vm0, %v773_v50, 0.0  ;;  %v874_v18 = vsel %vm635_vm0, %v774_v51, 0.0  ;;  %v881_v20 = vsel %vm635_vm0, %v775_v52, 0.0  ;;  %v834_v21 = vadd.f32 %v833_v10, %v832_v63 }
 0x133   : > { %v841_v22 = vadd.f32 %v840_v11, %v839_v1  ;;  %v848_v23 = vadd.f32 %v847_v12, %v846_v3  ;;  %v855_v25 = vadd.f32 %v854_v13, %v853_v4  ;;  %v861_v26 = vrot.slane %v860_v16, 4 }
 0x134   : > { %v868_v27 = vrot.slane %v867_v17, 4  ;;  %v875_v28 = vrot.slane %v874_v18, 4  ;;  %v882_v30 = vrot.slane %v881_v20, 4  ;;  %v835_v31 = vrot.slane %v834_v21, 2 }
 0x135   : > { %v842_v33 = vrot.slane %v841_v22, 2  ;;  %v849_v35 = vrot.slane %v848_v23, 2  ;;  %v856_v36 = vrot.slane %v855_v25, 2  ;;  %v862_v37 = vadd.f32 %v861_v26, %v860_v16 }
 0x136   : > { %v869_v40 = vadd.f32 %v868_v27, %v867_v17  ;;  %v876_v41 = vadd.f32 %v875_v28, %v874_v18  ;;  %v883_v42 = vadd.f32 %v882_v30, %v881_v20  ;;  %v836_v43 = vadd.f32 %v835_v31, %v834_v21 }
 0x137   : > { %v843_v45 = vadd.f32 %v842_v33, %v841_v22  ;;  %v850_v46 = vadd.f32 %v849_v35, %v848_v23  ;;  %v857_v47 = vadd.f32 %v856_v36, %v855_v25  ;;  %v863_v48 = vrot.slane %v862_v37, 2 }
 0x138   : > { %v870_v50 = vrot.slane %v869_v40, 2  ;;  %v877_v51 = vrot.slane %v876_v41, 2  ;;  %v884_v52 = vrot.slane %v883_v42, 2  ;;  %v837_v63 = vrot.slane %v836_v43, 1 }
 0x139   : > { %v844_v1 = vrot.slane %v843_v45, 1  ;;  %v851_v3 = vrot.slane %v850_v46, 1  ;;  %v858_v4 = vrot.slane %v857_v47, 1  ;;  %v864_v10 = vadd.f32 %v863_v48, %v862_v37 }
 0x13a   : > { %v871_v11 = vadd.f32 %v870_v50, %v869_v40  ;;  %v878_v12 = vadd.f32 %v877_v51, %v876_v41  ;;  %v885_v13 = vadd.f32 %v884_v52, %v883_v42  ;;  %v809_v16 = vrot.slane %v2385_v57, 1 }
 0x13b   : > { %v838_v17 = vadd.f32 %v837_v63, %v836_v43  ;;  %v845_v18 = vadd.f32 %v844_v1, %v843_v45  ;;  %v852_v20 = vadd.f32 %v851_v3, %v850_v46  ;;  %v816_v21 = vrot.slane %v2387_v60, 1 }
 0x13c   : > { %v865_v22 = vrot.slane %v864_v10, 1  ;;  %v872_v23 = vrot.slane %v871_v11, 1  ;;  %v823_v25 = vrot.slane %v2389_v61, 1  ;;  %v879_v26 = vrot.slane %v878_v12, 1 }
 0x13d   : > { %v1084_v27 = vsel %vm971_vm1, %v789_v6, %v782_v5  ;;  %v1091_v28 = vsel %vm971_vm1, %v845_v18, %v838_v17  ;;  %v803_v30 = vadd.f32 %v802_v53, %v2374_v32  ;;  %v830_v31 = vrot.slane %v2397_v38, 1 }
 0x13e   : > { %v859_v33 = vadd.f32 %v858_v4, %v857_v47  ;;  %v886_v35 = vrot.slane %v885_v13, 1  ;;  %v810_v36 = vadd.f32 %v809_v16, %v2385_v57  ;;  %v866_v37 = vadd.f32 %v865_v22, %v864_v10  ;;  %v1067_v10 = vld [vmem:[%s2629_s4] sm:$0xff] }
 0x13f   : > { %v1085_v40 = vsel %vm973_vm2, %v2395_v8, %v1084_v27  ;;  %v1092_v41 = vsel %vm973_vm2, %v852_v20, %v1091_v28  ;;  %v817_v5 = vadd.f32 %v816_v21, %v2387_v60  ;;  %v873_v6 = vadd.f32 %v872_v23, %v871_v11 }
 0x140   : > { %v1086_v42 = vsel %vm975_vm3, %v803_v30, %v1085_v40  ;;  %v1093_v43 = vsel %vm975_vm3, %v859_v33, %v1092_v41  ;;  %v824_v32 = vadd.f32 %v823_v25, %v2389_v61  ;;  %v880_v53 = vadd.f32 %v879_v26, %v878_v12 }
 0x141   : > { %v1087_v45 = vsel %vm977_vm4, %v810_v36, %v1086_v42  ;;  %v1094_v57 = vsel %vm977_vm4, %v866_v37, %v1093_v43  ;;  %v831_v46 = vadd.f32 %v830_v31, %v2397_v38  ;;  %v887_v47 = vadd.f32 %v886_v35, %v885_v13 }
 0x142   : > { %v1088_v8 = vsel %vm979_vm5, %v817_v5, %v1087_v45  ;;  %v1095_v48 = vsel %vm979_vm5, %v873_v6, %v1094_v57  ;;  %v2094_v11 = vmov 0.0  }
 0x143   : > { %v1089_v60 = vsel %vm981_vm6, %v824_v32, %v1088_v8  ;;  %v1096_v50 = vsel %vm981_vm6, %v880_v53, %v1095_v48  ;;  %1859 = vmatprep.mubr.msk.f32.mxu1 %vm2093_vm8, %v2094_v11  ;;  %1852 = vmatprep.mubr.msk.f32.mxu0 %vm2093_vm8, %v2094_v11 }
 0x144   : > { %v1090_v51 = vsel %vm983_vm7, %v831_v46, %v1089_v60  ;;  %v1097_v61 = vsel %vm983_vm7, %v887_v47, %v1096_v50 }
 0x145   : > { %v1903_v52 = vpack.c.bf16 %v1097_v61, %v1090_v51 }
 0x147   : > { %1904 = vmatpush3.bf16.msra.mxu1 %v1903_v52 }
 0x148   : > { %1869 = vmatprep.subr.mxu1 %v2094_v11 }
 0x14a   : > { %1860 = vmatmul.mubr.msk.f32.vlgmr.msra.gmra.mrb[0].mxu1 %vm635_vm0, %v1067_v10 }
 0x14b   : > { %1871 = vmatprep.mubr.msk.f32.mxu1 %vm2093_vm8, %v2094_v11 }
 0x178   : > { %v669_v63 = vpop.xlane.xlu0 %668 }
 0x179   : > { %v670_v1 = vsub.f32 %v2352_v15, %v669_v63 }
 0x17b   : > { %v671_v3 = vmul.f32 1.442695, %v670_v1 }
 0x17d   : > { %1975 = vpow2.f32 %v671_v3 }
 0x187   : > { %v1976_v38 = vpop.eup %1975 }
 0x188   : > { %v673_v4 = vsel %vm635_vm0, %v1976_v38, 0.0 }
 0x189   : > { %674 = vadd.xlane.f32.xlu1 %v673_v4 }
 0x216   : > { %v675_v15 = vpop.xlane.xlu1 %674 }
 0x217   : > { %1977 = vrcp.f32 %v675_v15 }
 0x221   : > { %v1978_v12 = vpop.eup %1977 }
 0x222   : > { %v677_v13 = vmul.f32 %v1978_v12, %v1976_v38 }
 0x224   : > { %v704_v16 = vmul.f32 %v677_v13, %v2309_v24  ;;  %v696_v17 = vmul.f32 %v677_v13, %v2273_v56  ;;  %v698_v21 = vmul.f32 %v677_v13, %v2276_v58  ;;  %v697_v22 = vmul.f32 %v677_v13, %v2279_v59 }
 0x225   : > { %v699_v26 = vmul.f32 %v677_v13, %v2283_v62  ;;  %v705_v24 = vmul.f32 %v677_v13, %v2314_v29  ;;  %v700_v58 = vmul.f32 %v677_v13, %v2288_v2  ;;  %v706_v59 = vmul.f32 %v677_v13, %v2319_v34 }
 0x226   : > { %v736_v18 = vsel %vm635_vm0, %v704_v16, 0.0  ;;  %v712_v20 = vsel %vm635_vm0, %v696_v17, 0.0  ;;  %v718_v23 = vsel %vm635_vm0, %v698_v21, 0.0  ;;  %v715_v25 = vsel %vm635_vm0, %v697_v22, 0.0 }
 0x227   : > { %737 = vadd.xlane.f32.xlu1 %v736_v18  ;;  %713 = vadd.xlane.f32.xlu0 %v712_v20  ;;  %v721_v56 = vsel %vm635_vm0, %v699_v26, 0.0  ;;  %v739_v27 = vsel %vm635_vm0, %v705_v24, 0.0  ;;  %v724_v28 = vsel %vm635_vm0, %v700_v58, 0.0  ;;  %v742_v30 = vsel %vm635_vm0, %v706_v59, 0.0 }
 0x228   : > { %v701_v62 = vmul.f32 %v677_v13, %v2294_v9  ;;  %v707_v29 = vmul.f32 %v677_v13, %v2324_v39  ;;  %v702_v2 = vmul.f32 %v677_v13, %v2299_v14  ;;  %v708_v34 = vmul.f32 %v677_v13, %v2329_v44 }
 0x229   : > { %v703_v9 = vmul.f32 %v677_v13, %v2304_v19  ;;  %v709_v39 = vmul.f32 %v677_v13, %v2334_v49  ;;  %v710_v14 = vmul.f32 %v677_v13, %v2339_v55  ;;  %v711_v41 = vmul.f32 %v677_v13, %v2344_v0  ;;  %v2474_v19 = vpop.f32.mrb[0].mxu1 }
 0x22a   : > { %v727_v31 = vsel %vm635_vm0, %v701_v62, 0.0  ;;  %v745_v33 = vsel %vm635_vm0, %v707_v29, 0.0  ;;  %v730_v35 = vsel %vm635_vm0, %v702_v2, 0.0  ;;  %v748_v36 = vsel %vm635_vm0, %v708_v34, 0.0  ;;  %v1861_v49 = vpop.f32.mrb[1].mxu1  ;;  %v2515_v2 = vld [vmem:[%s370_s28 + $0x8] sm:$0xff] }
 0x22b   : > { %719 = vadd.xlane.f32.xlu1 %v718_v23  ;;  %716 = vadd.xlane.f32.xlu0 %v715_v25  ;;  %v733_v37 = vsel %vm635_vm0, %v703_v9, 0.0  ;;  %v751_v40 = vsel %vm635_vm0, %v709_v39, 0.0  ;;  %v754_v44 = vsel %vm635_vm0, %v710_v14, 0.0  ;;  %v757_v5 = vsel %vm635_vm0, %v711_v41, 0.0  ;;  %v1414_v9 = vld [vmem:[%s2631_s6] sm:$0xff]  ;;  %v1498_v41 = vld [vmem:[%s2632_s7 + $0x8] sm:$0xff] }
 0x22f   : > { %722 = vadd.xlane.f32.xlu1 %v721_v56  ;;  %740 = vadd.xlane.f32.xlu0 %v739_v27 }
 0x233   : > { %725 = vadd.xlane.f32.xlu1 %v724_v28  ;;  %743 = vadd.xlane.f32.xlu0 %v742_v30 }
 0x237   : > { %728 = vadd.xlane.f32.xlu1 %v727_v31  ;;  %746 = vadd.xlane.f32.xlu0 %v745_v33  ;;  %v2513_v33 = vld [vmem:[%s370_s28] sm:$0xff]  ;;  %s1823_s28 = sshll.u32 %s2169_s13, 8  ;;  %s2019_s13 = scalar_lea.vmem %s2575_s19, 256 }
 0x238   : > { %s2580_s16 = scalar_lea.hbm %s2634_s9, %s1823_s28  ;;  %p2020_p11 = scmp.ne.s32.totalorder %s2575_s19, %s2019_s13 }
 0x239   : > { %p2027_p0 = scmp.lt.s32.totalorder %s2025_s23, %s2019_s13 }
 0x23a   : > { %p2021_p13 = pnand %p2020_p11, %p2641_p12 }
 0x23b   : > { %731 = vadd.xlane.f32.xlu1 %v730_v35  ;;  %749 = vadd.xlane.f32.xlu0 %v748_v36  ;;  %v888_v35 = vld [vmem:[%s2628_s3] sm:$0xff]  ;;  %p2028_p2 = por %p2027_p0, %p2026_p10 }
 0x23c   : > { %v1173_v36 = vld [vmem:[%s2630_s5] sm:$0xff]  ;;  %p2022_p8 = pneg %p2021_p13 }
 0x23e   : > { %p2029_p4 = pnand %p2028_p2, %p2022_p8 }
 0x23f   : > { %734 = vadd.xlane.f32.xlu1 %v733_v37  ;;  %752 = vadd.xlane.f32.xlu0 %v751_v40  ;;  %v1415_v37 = vld [vmem:[%s2631_s6 + $0x8] sm:$0xff] }
 0x243   : > { %755 = vadd.xlane.f32.xlu0 %v754_v44  ;;  %v1497_v44 = vld [vmem:[%s2632_s7] sm:$0xff] }
 0x247   : > { %758 = vadd.xlane.f32.xlu0 %v757_v5 }
 0x250   : > { %1248 = vrot.lane.b32.xlu1 %v2474_v19, %s2095_s26 }
 0x2b4   : > { %v738_v6 = vpop.xlane.xlu1 %737  ;;  %v714_v55 = vpop.xlane.xlu0 %713 }
 0x2b5   : > { %v910_v50 = vrot.slane %v714_v55, %v2262_v7  ;;  %v942_v63 = vrot.slane %v738_v6, %v2262_v7 }
 0x2b8   : > { %v720_v42 = vpop.xlane.xlu1 %719  ;;  %v717_v43 = vpop.xlane.xlu0 %716 }
 0x2b9   : > { %v914_v48 = vrot.slane %v717_v43, %v2262_v7  ;;  %v918_v61 = vrot.slane %v720_v42, %v2262_v7 }
 0x2bb   : > { %v972_v1 = vsel %vm971_vm1, %v914_v48, %v910_v50 }
 0x2bc   : > { %v723_v32 = vpop.xlane.xlu1 %722  ;;  %v741_v53 = vpop.xlane.xlu0 %740  ;;  %v974_v18 = vsel %vm973_vm2, %v918_v61, %v972_v1 }
 0x2bd   : > { %v946_v51 = vrot.slane %v741_v53, %v2262_v7  ;;  %v922_v3 = vrot.slane %v723_v32, %v2262_v7 }
 0x2bf   : > { %v985_v13 = vsel %vm971_vm1, %v946_v51, %v942_v63  ;;  %v976_v23 = vsel %vm975_vm3, %v922_v3, %v974_v18 }
 0x2c0   : > { %v726_v0 = vpop.xlane.xlu1 %725  ;;  %v744_v45 = vpop.xlane.xlu0 %743 }
 0x2c1   : > { %v950_v52 = vrot.slane %v744_v45, %v2262_v7  ;;  %v926_v4 = vrot.slane %v726_v0, %v2262_v7  ;;  %v1590_v0 = vld [vmem:[%s2633_s8] sm:$0xff] }
 0x2c3   : > { %v986_v20 = vsel %vm973_vm2, %v950_v52, %v985_v13  ;;  %v978_v24 = vsel %vm977_vm4, %v926_v4, %v976_v23 }
 0x2c4   : > { %v729_v57 = vpop.xlane.xlu1 %728  ;;  %v747_v46 = vpop.xlane.xlu0 %746 }
 0x2c5   : > { %v954_v38 = vrot.slane %v747_v46, %v2262_v7  ;;  %v930_v16 = vrot.slane %v729_v57, %v2262_v7 }
 0x2c7   : > { %v987_v25 = vsel %vm975_vm3, %v954_v38, %v986_v20  ;;  %v980_v58 = vsel %vm979_vm5, %v930_v16, %v978_v24 }
 0x2c8   : > { %v750_v47 = vpop.xlane.xlu0 %749  ;;  %v732_v8 = vpop.xlane.xlu1 %731 }
 0x2c9   : > { %v958_v10 = vrot.slane %v750_v47, %v2262_v7  ;;  %v934_v21 = vrot.slane %v732_v8, %v2262_v7 }
 0x2cb   : > { %v988_v56 = vsel %vm977_vm4, %v958_v10, %v987_v25  ;;  %v982_v30 = vsel %vm981_vm6, %v934_v21, %v980_v58 }
 0x2cc   : > { %v753_v60 = vpop.xlane.xlu0 %752  ;;  %v735_v15 = vpop.xlane.xlu1 %734 }
 0x2cd   : > { %v962_v17 = vrot.slane %v753_v60, %v2262_v7  ;;  %v938_v26 = vrot.slane %v735_v15, %v2262_v7 }
 0x2cf   : > { %v989_v59 = vsel %vm979_vm5, %v962_v17, %v988_v56  ;;  %v984_v29 = vsel %vm983_vm7, %v938_v26, %v982_v30 }
 0x2d0   : > { %v756_v12 = vpop.xlane.xlu0 %755 }
 0x2d1   : > { %v966_v22 = vrot.slane %v756_v12, %v2262_v7 }
 0x2d3   : > { %v990_v62 = vsel %vm981_vm6, %v966_v22, %v989_v59 }
 0x2d4   : > { %v759_v27 = vpop.xlane.xlu0 %758 }
 0x2d5   : > { %v970_v28 = vrot.slane %v759_v27, %v2262_v7  ;;  %v1906_v7 = vpack.c.bf16 %v2515_v2, %v2513_v33 }
 0x2d7   : > { %v991_v31 = vsel %vm983_vm7, %v970_v28, %v990_v62 }
 0x2d8   : > { %v1900_v34 = vpack.c.bf16 %v991_v31, %v984_v29 }
 0x2da   : > { %1901 = vmatpush3.bf16.msra.mxu0 %v1900_v34 }
 0x2db   : > { %1905 = vmatprep.subr.bf16.mxu0 %v2092_v54  ;;  %v1249_v54 = vpop.permute.xlu1 %1248 }
 0x2dd   : > { %1853 = vmatmul.mubr.msk.f32.vlgmr.msra.gmra.mrb[0].mxu0 %vm635_vm0, %v888_v35 }
 0x2de   : > { %1907 = vmatpush3.bf16.msra.mxu0 %v1906_v7  ;;  %1866 = vmatprep.mubr.msk.f32.mxu0 %vm2093_vm8, %v2094_v11 }
 0x2e1   : > { %1867 = vmatmul.mubr.msk.f32.vlgmr.msra.gmra.mrb[2].mxu0 %vm635_vm0, %v1173_v36 }
 0x2e2   : > { %1882 = vmatprep.mubr.msk.f32.mxu0 %vm1251_vm9, %v1414_v9 }
 0x3b0   : > { %v1063_v39 = vpop.f32.mrb[0].mxu0 }
 0x3b1   : > { %v1854_v40 = vpop.f32.mrb[1].mxu0  ;;  %1880 = vmatprep.subr.mxu0 %v1063_v39  ;;  %v1252_v14 = vsel %vm1251_vm9, %v1063_v39, %v1249_v54 }
 0x3b2   : > { %1253 = vxpose.xlu0.b32.start.end [1/1] (short) (narrow) %v1252_v14, 24  ;;  %1881 = vmatpush3.msra.mxu0 %v1063_v39 }
 0x3b3   : > { %1883 = vmatmul.mubr.msk.f32.vlgmr.msra.gmra.mrb[4].mxu0 %vm1251_vm9, %v1415_v37  ;;  %1885 = vmatprep.subr.mxu0 %v2474_v19 }
 0x3b4   : > { %1886 = vmatpush3.msra.mxu0 %v2474_v19  ;;  %1887 = vmatprep.mubr.msk.f32.mxu0 %vm1251_vm9, %v1497_v44  ;;  %v1243_v5 = vpop.f32.mrb[2].mxu0 }
 0x3b5   : > { %v1868_v49 = vpop.f32.mrb[3].mxu0  ;;  %1870 = vmatpush3.msra.mxu1 %v1243_v5 }
 0x3b7   : > { %1888 = vmatmul.mubr.msk.f32.vlgmr.msra.gmra.mrb[6].mxu0 %vm1251_vm9, %v1498_v41 }
 0x432   : > { %v1269_v6 = vpop.trf.xlu0 }
 0x433   : > { %1872 = vmatmul.mubr.msk.f32.vlgmr.msra.gmra.mrb[2].mxu1 %vm1251_vm9, %v1269_v6 }
 0x434   : > { %1874 = vmatprep.mubr.msk.f32.mxu1 %vm2093_vm8, %v2094_v11 }
 0x436   : > { %v1270_v55 = vpop.trf.xlu0 }
 0x437   : > { %1875 = vmatmul.mubr.msk.f32.gmra.mrb[4].mxu1 %vm1251_vm9, %v1270_v55 }
 0x438   : > { %1877 = vmatprep.mubr.msk.f32.mxu1 %vm2093_vm8, %v2094_v11  ;;  %v1591_v11 = vld [vmem:[%s2633_s8 + $0x8] sm:$0xff] }
 0x43a   : > { %v1271_v19 = vpop.trf.xlu0 }
 0x43b   : > { %1878 = vmatmul.mubr.msk.f32.gmra.mrb[6].mxu1 %vm1251_vm9, %v1271_v19 }
 0x486   : > { %v2556_v42 = vpop.f32.mrb[4].mxu0 }
 0x487   : > { %v1488_v43 = vpop.f32.mrb[5].mxu0 }
 0x48a   : > { %v1889_v32 = vpop.f32.mrb[6].mxu0 }
 0x48b   : > { %v1571_v53 = vpop.f32.mrb[7].mxu0 }
 0x48c   : > { %1582 = vrot.lane.b32.xlu1 %v1571_v53, %s2095_s26 }
 0x490   : > { %1584 = vrot.lane.b32.xlu1 %v1889_v32, %s2095_s26 }
 0x494   : > { %1594 = vperm.xlu1 %1968, %v1590_v0  }
 0x498   : > { %1599 = vperm.xlu1 %1968, %v1591_v11  }
 0x4fe   : > { %v1583_v45 = vpop.permute.xlu1 %1582 }
 0x4ff   : > { %v1588_v57 = vsel %vm1251_vm9, %v1488_v43, %v1583_v45 }
 0x500   : > { %1896 = vmatprep.mubr.msk.f32.mxu1 %vm1602_vm10, %v1588_v57 }
 0x502   : > { %v1585_v44 = vpop.permute.xlu1 %1584 }
 0x503   : > { %v1589_v41 = vsel %vm1251_vm9, %v2556_v42, %v1585_v44 }
 0x506   : > { %v1360_v46 = vpop.f32.mrb[2].mxu1 }
 0x507   : > { %v1374_v47 = vrot.slane %v1360_v46, 4  ;;  %v1873_v8 = vpop.f32.mrb[3].mxu1 }
 0x509   : > { %v1375_v48 = vmax.f32 %v1360_v46, %v1374_v47 }
 0x50a   : > { %v1365_v60 = vpop.f32.mrb[4].mxu1 }
 0x50b   : > { %v1376_v50 = vrot.slane %v1375_v48, 2  ;;  %v1876_v51 = vpop.f32.mrb[5].mxu1 }
 0x50d   : > { %v1377_v61 = vmax.f32 %v1375_v48, %v1376_v50 }
 0x50e   : > { %v1370_v52 = vpop.f32.mrb[6].mxu1 }
 0x50f   : > { %v1378_v63 = vrot.slane %v1377_v61, 1  ;;  %v1391_v1 = vmax.f32 %v1365_v60, %v1370_v52  ;;  %v1879_v3 = vpop.f32.mrb[7].mxu1 }
 0x511   : > { %v1379_v38 = vmax.f32 %v1377_v61, %v1378_v63  ;;  %v1392_v4 = vrot.slane %v1391_v1, 4 }
 0x513   : > { %v1380_v10 = vsub.f32 %v1360_v46, %v1379_v38  ;;  %v1393_v15 = vmax.f32 %v1391_v1, %v1392_v4  ;;  %v1595_v5 = vpop.permute.xlu1 %1594 }
 0x515   : > { %v1381_v12 = vmul.f32 1.442695, %v1380_v10  ;;  %v1394_v13 = vrot.slane %v1393_v15, 2 }
 0x517   : > { %1979 = vpow2.f32 %v1381_v12  ;;  %v1395_v16 = vmax.f32 %v1393_v15, %v1394_v13  ;;  %v1600_v49 = vpop.permute.xlu1 %1599 }
 0x519   : > { %v1396_v17 = vrot.slane %v1395_v16, 1 }
 0x51b   : > { %v1397_v18 = vmax.f32 %v1395_v16, %v1396_v17 }
 0x51d   : > { %v1398_v20 = vsub.f32 %v1365_v60, %v1397_v18  ;;  %v1399_v21 = vsub.f32 %v1370_v52, %v1397_v18 }
 0x51f   : > { %v1400_v22 = vmul.f32 1.442695, %v1398_v20  ;;  %v1402_v23 = vmul.f32 1.442695, %v1399_v21 }
 0x521   : > { %v1980_v25 = vpop.eup %1979  ;;  %1981 = vpow2.f32 %v1400_v22 }
 0x522   : > { %1983 = vpow2.f32 %v1402_v23  ;;  %v1383_v26 = vrot.slane %v1980_v25, 4 }
 0x524   : > { %v1384_v24 = vadd.f32 %v1980_v25, %v1383_v26 }
 0x526   : > { %v1385_v56 = vrot.slane %v1384_v24, 2 }
 0x528   : > { %v1386_v28 = vadd.f32 %v1385_v56, %v1384_v24 }
 0x52a   : > { %v1387_v29 = vrot.slane %v1386_v28, 1 }
 0x52b   : > { %v1982_v27 = vpop.eup %1981 }
 0x52c   : > { %v1984_v58 = vpop.eup %1983  ;;  %v1388_v35 = vadd.f32 %v1387_v29, %v1386_v28 }
 0x52d   : > { %v1404_v59 = vadd.f32 %v1984_v58, %v1982_v27 }
 0x52e   : > { %1985 = vrcp.f32 %v1388_v35 }
 0x52f   : > { %v1405_v30 = vrot.slane %v1404_v59, 4 }
 0x531   : > { %v1406_v62 = vadd.f32 %v1405_v30, %v1404_v59 }
 0x533   : > { %v1407_v31 = vrot.slane %v1406_v62, 2 }
 0x535   : > { %v1408_v34 = vadd.f32 %v1407_v31, %v1406_v62 }
 0x537   : > { %v1409_v7 = vrot.slane %v1408_v34, 1 }
 0x538   : > { %v1986_v9 = vpop.eup %1985 }
 0x539   : > { %v1410_v36 = vadd.f32 %v1409_v7, %v1408_v34  ;;  %v1390_v39 = vmul.f32 %v1986_v9, %v1980_v25 }
 0x53b   : > { %1987 = vrcp.f32 %v1410_v36 }
 0x545   : > { %v1988_v54 = vpop.eup %1987 }
 0x546   : > { %v1412_v37 = vmul.f32 %v1988_v54, %v1982_v27  ;;  %v1413_v40 = vmul.f32 %v1988_v54, %v1984_v58 }
 0x548   : > { %v1908_v14 = vpack.c.bf16 %v1412_v37, %v1390_v39 }
 0x54a   : > { %1909 = vmatprep.subr.bf16.mxu1 %v1908_v14 }
 0x54b   : > { %1911 = vmatpush3.bf16.msra.mxu1 %v1908_v14 }
 0x54c   : > { %1894 = vmatprep.subr.mxu1 %v1413_v40 }
 0x54f   : > { %1895 = vmatpush3.msra.mxu1 %v1413_v40 }
 0x550   : > { %1897 = vmatmul.mubr.msk.f32.vlgmr.msra.gmra.mrb[8].mxu1 %vm1602_vm10, %v1589_v41 }
 0x623   : > { %v1898_v6 = vpop.f32.mrb[8].mxu1 }
 0x624   : > { %v1681_v55 = vadd.f32 %v1898_v6, %v1600_v49  ;;  %v1675_v19 = vpop.f32.mrb[9].mxu1 }
 0x625   : > { %v1676_v43 = vadd.f32 %v1675_v19, %v1595_v5 }
 0x626   : > { %v1685_v32 = vadd.f32 %v1681_v55, %v2515_v2 }
 0x627   : > { %v1684_v53 = vadd.f32 %v1676_v43, %v2513_v33 }
 0x628   : > { %vm1687_vm11 = vcmp.ge.f32.partialorder %v1685_v32, 0.0  ;;  %v1689_v42 = vmul.f32 0.2, %v1685_v32 }
 0x629   : > { %vm1686_vm12 = vcmp.ge.f32.partialorder %v1684_v53, 0.0  ;;  %v1688_v0 = vmul.f32 0.2, %v1684_v53 }
 0x62a   : > { %v1691_v11 = vsel %vm1687_vm11, %v1685_v32, %v1689_v42 }
 0x62b   : > { %1693 = vst [vmem:[%s365_s24 + $0x8] sm:$0xff] %v1691_v11  ;;  %v1690_v2 = vsel %vm1686_vm12, %v1684_v53, %v1688_v0 }
 0x62c   : > { %1692 = vst [vmem:[%s365_s24] sm:$0xff] %v1690_v2 }
 0x62d   : > { %2032 = shalt.err (!%p2029_p4)
}
 0x62e   : > { %s2033_s24 = scalar_lea.hbm %s2580_s16, 256  ;;  %s2037_s20 = scalar_lea.hbm %s2634_s9, 512 }
 0x62f   : > { %p2034_p5 = scmp.ne.s32.totalorder %s2580_s16, %s2033_s24  ;;  %p2038_p1 = scmp.lt.u32.totalorder %s2580_s16, %s2634_s9 }
 0x630   : > { %p2039_p3 = scmp.lt.u32.totalorder %s2037_s20, %s2033_s24  ;;  %p2041_p11 = scmp.lt.u32.totalorder %s2033_s24, %s2580_s16 }
 0x631   : > { %p2035_p7 = pnand %p2034_p5, %p2641_p12 }
 0x632   : > { %p2040_p6 = por %p2039_p3, %p2038_p1 }
 0x633   : > { %p2036_p9 = pneg %p2035_p7 }
 0x634   : > { %p2042_p13 = por %p2041_p11, %p2040_p6 }
 0x636   : > { %p2043_p8 = pnand %p2042_p13, %p2036_p9 }
 0x638   : > { %2046 = shalt.err (!%p2043_p8)
}
 0x639   : > { %s2097_s13 = smov 128  }
 0x63a   : > { %1914 = dma.vmem_to_hbm [thread:$0]  (%p2641_p12), %s2575_s19, 256, %s2580_s16, %s1695_s17, %s2097_s13, %s2097_s13, %s2095_s26  }
 0x63b PF: > { %s1723_s23 = sand.u32 1, %s2073_s30   ;;  %p2642_p10 = scmp.ne.s32.totalorder %s2639_s22, 0 }
 0x63c   : > { %p2643_p0 = scmp.ge.s32.totalorder %s2085_s12, 2  ;;  %s1724_s24 = scalar_lea.sflag [#allocation4], %s1723_s23 }
 0x63e   : > { %p1921_p2 = pnand %p2643_p0, %p2642_p10 }
 0x640   : > { %2068 = dma.done.wait (!%p1921_p2), %s1724_s24, 256  }
 0x641   : > { %2070 = vsyncadd (!%p1921_p2), %s1724_s24, 4294967040  ;;  %p22_p4 = scmp.ge.s32.totalorder %s2173_s15, 4   ;;  %s2644_s30 = smov %s2077_s10 }
 0x642   : > { %s2645_s10 = smov %s2081_s11  ;;  %s2646_s11 = smov %s2185_s18 }
 0x643   : > { %s2647_s12 = smov %s2173_s15  ;;  %24 = sbr.rel (!%p22_p4) target bundleno = 5 (0x5), region = 104 }
 0x64a   :  { %1729 = vsyncpa [#allocation3], 1 }
 0x64b   :  { %1731 = vsyncpa [#allocation3 + $0x1], 1 }
 0x64c   :  { %1732 = vsyncpa [#allocation4], 1 }
 0x64d   :  { %1734 = vsyncpa [#allocation4 + $0x1], 1 }

</bundles_post_ra>
